<compile_context>
chip_gen: v6e
topology: v6e:2x2x1
jax: 0.10.0
libtpu: 0.0.40
codegen_flags: <defaults>
</compile_context>

<pallas_src>
import jax
import jax.numpy as jnp
from jax.experimental import pallas as pl
from jax.experimental.pallas import tpu as pltpu


def _masked_sum_kernel(h_ref, m_ref, o_ref):
    # grid = (B // tb, S // ts).  Axis 0 (batch) is "parallel"; axis 1 (seq) is
    # the reduction and MUST stay the innermost, "arbitrary" axis: the output
    # block index ignores it, so o_ref stays resident in VMEM across the
    # sequence steps and acts as the f32 accumulator.
    s_idx = pl.program_id(1)

    @pl.when(s_idx == 0)
    def _init():
        o_ref[...] = jnp.zeros_like(o_ref)

    h = h_ref[...]                                   # (tb, ts, H) native dtype
    m = m_ref[...]                                   # (tb, ts)    f32 0/1 mask
    tb, ts = m.shape
    hidden = h.shape[-1]

    # Block-diagonal mask (tb, tb*ts): bd[i, i*ts + t] = m[i, t], else 0.
    # Turns the masked sum over this sequence chunk into ONE MXU matmul
    # (M=tb, K=tb*ts, N=H) instead of tb separate M=1 matmuls.
    m_tiled = jnp.concatenate([m] * tb, axis=1)                    # (tb, tb*ts)
    row = jax.lax.broadcasted_iota(jnp.int32, (tb, tb * ts), 0)
    col = jax.lax.broadcasted_iota(jnp.int32, (tb, tb * ts), 1)
    in_block = (col >= row * ts) & (col < row * ts + ts)
    bd = jnp.where(in_block, m_tiled, 0.0).astype(h.dtype)

    o_ref[...] += jnp.dot(bd, h.reshape(tb * ts, hidden),
                          preferred_element_type=jnp.float32)


def _vmem_capacity_bytes():
    try:
        return int(pltpu.get_tpu_info().vmem_capacity_bytes)
    except Exception:
        return 64 << 20  # conservative default (v7x per-TensorCore VMEM)


def _choose_tb(B):
    # tb must be a multiple of 8 (output sublane dim) or equal to B.
    # tb == 8 keeps >= 2 batch grid steps for B >= 16 so the "parallel" batch
    # axis can split across v7x's two TensorCores.
    return 8 if (B % 8 == 0 and B > 8) else B


def _choose_ts(S, tb, H, elt, target_bytes):
    # ts must be a multiple of 128 (mask lane dim / hidden sublane dim) or == S.
    if S % 128 != 0 or S * tb * H * elt <= 2 * target_bytes:
        return S  # full sequence per step; ts == full dim is always legal.
    n128 = S // 128
    want = max(1, target_bytes // (tb * 128 * H * elt))
    d = min(n128, want)
    while n128 % d:
        d -= 1
    return 128 * d


def feedback_head(last_hidden_state, attention_mask, fc_weight, fc_bias,
                  *, tb=None, ts=None):
    """last_hidden_state: [B, S, H] (f32 or bf16), attention_mask: [B, S],
    fc_weight: [6, H] (torch layout), fc_bias: [6].  Returns f32 [B, 6]."""
    B, S, H = last_hidden_state.shape
    dt = last_hidden_state.dtype
    elt = jnp.dtype(dt).itemsize

    cap = _vmem_capacity_bytes()
    # ~8 MiB hidden-state tiles on v5e/v6e (128 MiB VMEM), ~4 MiB on v7x (64 MiB).
    target = (8 << 20) if cap >= (96 << 20) else (4 << 20)

    if tb is None:
        tb = _choose_tb(B)
    if ts is None:
        ts = _choose_ts(S, tb, H, elt, target)
    if not (tb == B or (B % tb == 0 and tb % 8 == 0)):
        raise ValueError(f"tb must divide B and be a multiple of 8 (or == B): {B=}, {tb=}")
    if not (ts == S or (S % ts == 0 and ts % 128 == 0)):
        raise ValueError(f"ts must divide S and be a multiple of 128 (or == S): {S=}, {ts=}")

    mask_f32 = attention_mask.astype(jnp.float32).reshape(B, S)

    # VMEM budget: double-buffered hidden + mask tiles, resident output block,
    # in-kernel block-diagonal temp, plus headroom; capped below physical VMEM.
    hid_tile = tb * ts * H * elt
    msk_tile = tb * ts * 4
    out_tile = tb * H * 4
    need = 2 * (hid_tile + msk_tile + out_tile) + tb * tb * ts * 4 + (8 << 20)
    vmem_limit = int(min(max(need, 16 << 20), (cap * 5) // 8))

    pooled_sum = pl.pallas_call(
        _masked_sum_kernel,
        out_shape=jax.ShapeDtypeStruct((B, H), jnp.float32),
        grid_spec=pltpu.PrefetchScalarGridSpec(
            num_scalar_prefetch=0,
            grid=(B // tb, S // ts),
            in_specs=[
                pl.BlockSpec((tb, ts, H), lambda b, s: (b, s, 0)),   # hidden states
                pl.BlockSpec((tb, ts), lambda b, s: (b, s)),         # mask [B, S]
            ],
            out_specs=pl.BlockSpec((tb, H), lambda b, s: (b, 0)),    # masked sums
        ),
        compiler_params=pltpu.CompilerParams(
            dimension_semantics=("parallel", "arbitrary"),
            vmem_limit_bytes=vmem_limit,
        ),
    )(last_hidden_state, mask_f32)

    # MeanPooling finalize + Linear(H, 6): O(B*H), fused by XLA.
    denom = jnp.maximum(jnp.sum(mask_f32, axis=1, keepdims=True), 1e-9)  # clamp(min=1e-9)
    mean = pooled_sum / denom                                            # (B, H) f32
    logits = jnp.dot(mean, fc_weight.T.astype(jnp.float32),
                     precision=jax.lax.Precision.HIGHEST)
    return logits + fc_bias.astype(jnp.float32)


def reference_head(last_hidden_state, attention_mask, fc_weight, fc_bias):
    m = attention_mask.astype(jnp.float32)[:, :, None]
    s = jnp.sum(last_hidden_state.astype(jnp.float32) * m, axis=1)
    d = jnp.maximum(jnp.sum(m, axis=1), 1e-9)
    mean = s / d
    return jnp.dot(mean, fc_weight.T.astype(jnp.float32),
                   precision=jax.lax.Precision.HIGHEST) + fc_bias


if __name__ == "__main__":
    # Small but tiling-realistic shapes (exercise (8,128) alignment and both grid axes).
    B, S, H, OUT = 16, 256, 128, 6
    initializer_range = 0.02  # typical HF config.initializer_range

    key = jax.random.PRNGKey(0)
    k_h, k_w = jax.random.split(key, 2)

    # Synthetic backbone output (stand-in for backbone(**inputs).last_hidden_state)
    last_hidden_state = jax.random.normal(k_h, (B, S, H), dtype=jnp.float32)

    # Attention mask: mix of full-length and padded rows (deterministic).
    lengths = jnp.array([S if i % 3 == 0 else (i * 37) % S + 1 for i in range(B)],
                        dtype=jnp.int32)
    attention_mask = (jnp.arange(S)[None, :] < lengths[:, None]).astype(jnp.float32)

    # fc init: weight ~ N(0, initializer_range), bias = 0  (matches _init_weights)
    fc_weight = initializer_range * jax.random.normal(k_w, (OUT, H), dtype=jnp.float32)
    fc_bias = jnp.zeros((OUT,), dtype=jnp.float32)

    ref = reference_head(last_hidden_state, attention_mask, fc_weight, fc_bias)

    # Auto tiling (here: full-S blocks, single sequence step per batch block).
    out_auto = feedback_head(last_hidden_state, attention_mask, fc_weight, fc_bias)
    # Explicit seq tiling to exercise the multi-step reduction / accumulator path.
    out_tiled = feedback_head(last_hidden_state, attention_mask, fc_weight, fc_bias,
                              tb=8, ts=128)
    out_auto, out_tiled = jax.block_until_ready((out_auto, out_tiled))

    assert out_auto.shape == (B, OUT) and out_tiled.shape == (B, OUT)
    assert jnp.allclose(out_auto, ref, atol=1e-3, rtol=1e-3), "auto-tile mismatch vs reference"
    assert jnp.allclose(out_tiled, ref, atol=1e-3, rtol=1e-3), "seq-tiled mismatch vs reference"

    print("KERNEL_OK")
</pallas_src>

<mosaic_0001>
module attributes {stable_mosaic.version = 11 : i64} {
  func.func @_masked_sum_kernel(%arg0: i32, %arg1: i32, %arg2: memref<8x256x128xf32, #tpu.memory_space<vmem>>, %arg3: memref<8x256xf32, #tpu.memory_space<vmem>>, %arg4: memref<8x128xf32, #tpu.memory_space<vmem>>) attributes {dimension_semantics = [#tpu.dimension_semantics<parallel>, #tpu.dimension_semantics<arbitrary>], iteration_bounds = array<i64: 2, 1>, scalar_prefetch = 0 : i64, scratch_operands = 0 : i64, tpu.core_type = #tpu.core_type<tc>, window_params = [{transform_indices = @transform_0, window_bounds = array<i64: 8, 256, 128>}, {transform_indices = @transform_1, window_bounds = array<i64: 8, 256>}, {transform_indices = @transform_2, window_bounds = array<i64: 8, 128>}]} {
    %c0_i32 = arith.constant 0 : i32
    %0 = arith.cmpi eq, %arg1, %c0_i32 : i32
    %1 = arith.extui %0 : i1 to i32
    %c0_i32_0 = arith.constant 0 : i32
    %2 = arith.cmpi ne, %1, %c0_i32_0 : i32
    scf.if %2 {
      %cst_12 = arith.constant 0.000000e+00 : f32
      %24 = vector.broadcast %cst_12 : f32 to vector<8x128xf32>
      %c0_13 = arith.constant 0 : index
      %c0_14 = arith.constant 0 : index
      %25 = vector.load %arg4[%c0_13, %c0_14] : memref<8x128xf32, #tpu.memory_space<vmem>>, vector<8x128xf32>
      tpu.vector_store %arg4[%c0_13, %c0_14], %24 {strides = array<i32>} : memref<8x128xf32, #tpu.memory_space<vmem>>, vector<8x128xf32>,
    } else {
    }
    %c0 = arith.constant 0 : index
    %c0_1 = arith.constant 0 : index
    %c0_2 = arith.constant 0 : index
    %3 = vector.load %arg2[%c0, %c0_1, %c0_2] : memref<8x256x128xf32, #tpu.memory_space<vmem>>, vector<8x256x128xf32>
    %c0_3 = arith.constant 0 : index
    %c0_4 = arith.constant 0 : index
    %4 = vector.load %arg3[%c0_3, %c0_4] : memref<8x256xf32, #tpu.memory_space<vmem>>, vector<8x256xf32>
    %5 = tpu.concatenate %4, %4, %4, %4, %4, %4, %4, %4 in 1 : vector<8x256xf32>, vector<8x256xf32>, vector<8x256xf32>, vector<8x256xf32>, vector<8x256xf32>, vector<8x256xf32>, vector<8x256xf32>, vector<8x256xf32> -> vector<8x2048xf32>
    %6 = tpu.iota {dimensions = array<i32: 0>} : vector<8x2048xi32>
    %7 = tpu.iota {dimensions = array<i32: 1>} : vector<8x2048xi32>
    %c256_i32 = arith.constant 256 : i32
    %8 = vector.broadcast %c256_i32 : i32 to vector<8x2048xi32>
    %9 = arith.muli %6, %8 : vector<8x2048xi32>
    %10 = arith.cmpi sge, %7, %9 : vector<8x2048xi32>
    %c256_i32_5 = arith.constant 256 : i32
    %11 = vector.broadcast %c256_i32_5 : i32 to vector<8x2048xi32>
    %12 = arith.muli %6, %11 : vector<8x2048xi32>
    %c256_i32_6 = arith.constant 256 : i32
    %13 = vector.broadcast %c256_i32_6 : i32 to vector<8x2048xi32>
    %14 = arith.addi %12, %13 : vector<8x2048xi32>
    %15 = arith.cmpi slt, %7, %14 : vector<8x2048xi32>
    %16 = arith.andi %10, %15 : vector<8x2048xi1>
    %cst = arith.constant 0.000000e+00 : f32
    %17 = vector.broadcast %cst : f32 to vector<8x2048xf32>
    %18 = arith.select %16, %5, %17 : vector<8x2048xi1>, vector<8x2048xf32>
    %c0_7 = arith.constant 0 : index
    %c0_8 = arith.constant 0 : index
    %19 = vector.load %arg4[%c0_7, %c0_8] : memref<8x128xf32, #tpu.memory_space<vmem>>, vector<8x128xf32>
    %20 = vector.shape_cast %3 : vector<8x256x128xf32> to vector<2048x128xf32>
    %cst_9 = arith.constant dense<0.000000e+00> : vector<8x128xf32>
    %21 = tpu.matmul %18, %20, %cst_9 {dimension_numbers = #tpu.dot_dimension_numbers<[1], [0], [0], [1], [0, 0, 1, 1], [], []>} : vector<8x2048xf32>, vector<2048x128xf32>, vector<8x128xf32> -> vector<8x128xf32>
    %22 = arith.addf %19, %21 : vector<8x128xf32>
    %c0_10 = arith.constant 0 : index
    %c0_11 = arith.constant 0 : index
    %23 = vector.load %arg4[%c0_10, %c0_11] : memref<8x128xf32, #tpu.memory_space<vmem>>, vector<8x128xf32>
    tpu.vector_store %arg4[%c0_10, %c0_11], %22 {strides = array<i32>} : memref<8x128xf32, #tpu.memory_space<vmem>>, vector<8x128xf32>,
    return
  }
  func.func @transform_0(%arg0: i32, %arg1: i32) -> (i32, i32, i32) {
    %c0_i32 = arith.constant 0 : i32
    %c0_i32_0 = arith.constant 0 : i32
    return %arg0, %arg1, %c0_i32 : i32, i32, i32
  }
  func.func @transform_1(%arg0: i32, %arg1: i32) -> (i32, i32) {
    %c0_i32 = arith.constant 0 : i32
    return %arg0, %arg1 : i32, i32
  }
  func.func @transform_2(%arg0: i32, %arg1: i32) -> (i32, i32) {
    %c0_i32 = arith.constant 0 : i32
    %c0_i32_0 = arith.constant 0 : i32
    return %arg0, %c0_i32 : i32, i32
  }
}

</mosaic_0001>

<bundles_post_ra>
// kernel: tpu_custom_call.1
= control target key start
LH: loop header
LB: loop body
LE: loop exit
PB: predicated region body
PF: predicated region fallthrough
CT: control target
= control target key end

     0   :  { %7 = vsyncpa [#allocation3], 0  ;;  %s2463_s0 = inlined_call_operand.hbm [shape: f32[16,256,128], index: 0, kind: input, shape index: {}]   ;;  %s2464_s1 = inlined_call_operand.hbm [shape: f32[16,256], index: 1, kind: input, shape index: {}]   ;;  %s2465_s2 = inlined_call_operand.hbm [shape: f32[16,128], index: 2, kind: output, shape index: {}]  }
   0x1   :  { %9 = vsyncpa [#allocation3 + $0x1], 0 }
   0x2   :  { %10 = vsyncpa [#allocation6], 0 }
   0x3   :  { %12 = vsyncpa [#allocation6 + $0x1], 0 }
   0x4   :  { %13 = vsyncpa [#allocation4], 0 }
   0x5   :  { %15 = vsyncpa [#allocation4 + $0x1], 0  ;;  %s1806_s9 = smov 0   ;;  %s1808_s10 = smov 0  }
   0x6   :  { %s1810_s11 = smov 0   ;;  %s1812_s12 = smov 0  }
   0x7   :  { %s1814_s13 = smov 0   ;;  %s1816_s14 = smov 0  }
   0x8 LB: > { %s1256_s15 = sadd.s32 4294967295, %s1784_s14   ;;  %s1257_s16 = sadd.s32 4294967294, %s1784_s14   ;;  %s1784_s14 = sphi %s1816_s14, %s21_s14   ;;  %s1780_s13 = sphi %s1814_s13, %s2506_s13   ;;  %s1776_s12 = sphi %s1812_s12, %s2505_s12   ;;  %s1772_s11 = sphi %s1810_s11, %s2504_s11   ;;  %s1768_s10 = sphi %s1808_s10, %s2503_s10   ;;  %s1764_s9 = sphi %s1806_s9, %s2502_s9  }
   0x9   : > { %s33_s17 = sadd.s32 1, %s1780_s13  ;;  %s42_s18 = sadd.s32 1, %s1772_s11 }
   0xa   : > { %p35_p0 = scmp.ge.s32.totalorder %s33_s17, 2  ;;  %p49_p1 = scmp.ne.s32.totalorder %s1772_s11, %s1768_s10 }
   0xb   : > { %p50_p2 = scmp.eq.s32.totalorder %s1784_s14, 0  ;;  %p55_p3 = scmp.ne.s32.totalorder %s1768_s10, %s1764_s9 }
   0xc   : > { %s2508_s17 = smov (%p35_p0, %s33_s17), 0  ;;  %p56_p5 = scmp.eq.s32.totalorder %s1256_s15, 0 }
   0xd   : > { %p1847_p4 = por %p50_p2, %p49_p1  ;;  %s37_s20 = ssub.s32 %s1780_s13, %s2508_s17 }
   0xe   : > { %p107_p6 = scmp.eq.s32.totalorder %s1256_s15, 1  ;;  %p40_p7 = scmp.eq.s32.totalorder %s37_s20, 0 }
   0xf   : > { %p1853_p8 = por %p56_p5, %p55_p3  ;;  %p113_p10 = scmp.eq.s32.totalorder %s1257_s16, 1 }
  0x10   : > { %p1857_p9 = por %p107_p6, %p49_p1  ;;  %p1591_p13 = scmp.lt.s32.totalorder %s1784_s14, 2 }
  0x11   : > { %s1862_s23 = scalar_select %p40_p7, %s1772_s11, %s42_s18  }
  0x12   : > { %p1864_p11 = por %p113_p10, %p55_p3  ;;  %s1871_s25 = sand.u32 1, %s1772_s11  }
  0x13   : > { %s1260_s26 = sshll.u32 %s1871_s25, 11  ;;  %s1292_s27 = sshll.u32 %s1780_s13, 15 }
  0x14   : > { %s146_s30 = scalar_lea.hbm %s2463_s0, %s1292_s27  ;;  %s137_s3 = scalar_lea.vmem [#allocation2], %s1260_s26 }
  0x15   : > { %s147_s4 = sshll.u32 %s137_s3, 4  ;;  %p1880_p0 = pnand %p1591_p13, %p1847_p4  ;;  %s148_s4 = int_to_ptr.vmem [resolvable:$true] %s147_s4 }
  0x16   : > { %p1267_p1 = scmp.ge.s32.totalorder %s1784_s14, 1  ;;  %s134_s6 = scalar_lea.sflag [#allocation3], %s1871_s25 }
  0x17   : > { %p1646_p2 = pneg %p1880_p0  ;;  %s1657_s7 = scalar_lea.vmem %s148_s4, 32768 }
  0x18   : > { %p1658_p3 = scmp.ne.s32.totalorder %s148_s4, %s1657_s7  ;;  %s1786_s8 = smov [#allocation2]  }
  0x19   : > { %s1662_s15 = sshll.u32 %s1786_s8, 4  ;;  %s1663_s15 = int_to_ptr.vmem [resolvable:$false] %s1662_s15 }
  0x1a   : > { %p1660_p5 = pnand %p1658_p3, %p1646_p2  ;;  %s1664_s16 = scalar_lea.vmem %s1663_s15, 65536 }
  0x1b   : > { %p1665_p4 = scmp.lt.s32.totalorder %s148_s4, %s1663_s15  ;;  %p1666_p7 = scmp.lt.s32.totalorder %s1664_s16, %s1657_s7 }
  0x1c   : > { %p1661_p6 = pneg %p1660_p5 }
  0x1d   : > { %p1667_p10 = por %p1666_p7, %p1665_p4 }
  0x1f   : > { %p1668_p13 = pnand %p1667_p10, %p1661_p6 }
  0x21   : > { %1671 = shalt.err (!%p1668_p13)
}
  0x22   : > { %s1787_s18 = smov 128   ;;  %s1788_s19 = smov 8  }
  0x23   : > { %1583 = dma.hbm_to_vmem [thread:$0]  (!%p1880_p0), %s146_s30, 32768, %s148_s4, %s134_s6, %s1787_s18, %s1787_s18, %s1788_s19  }
  0x24   : > { %p176_p3 = scmp.lt.s32.totalorder %s1784_s14, 3  ;;  %s1264_s20 = sshll.u32 %s1871_s25, 4 }
  0x25   : > { %s1293_s26 = sshll.u32 %s1780_s13, 8  ;;  %s161_s7 = scalar_lea.vmem [#allocation5], %s1264_s20 }
  0x26   : > { %p1898_p5 = pnand %p1267_p1, %p176_p3  ;;  %s169_s3 = scalar_lea.hbm %s2464_s1, %s1293_s26 }
  0x27   : > { %s171_s8 = sshll.u32 %s161_s7, 4  ;;  %s158_s15 = scalar_lea.sflag [#allocation6], %s1871_s25  ;;  %s172_s8 = int_to_ptr.vmem [resolvable:$true] %s171_s8 }
  0x28   : > { %s1685_s16 = scalar_lea.vmem %s172_s8, 256  ;;  %s1789_s30 = smov [#allocation5]  }
  0x29   : > { %p1686_p6 = scmp.ne.s32.totalorder %s172_s8, %s1685_s16  ;;  %s1690_s4 = sshll.u32 %s1789_s30, 4  ;;  %s1691_s4 = int_to_ptr.vmem [resolvable:$false] %s1690_s4 }
  0x2a   : > { %s1692_s6 = scalar_lea.vmem %s1691_s4, 512  ;;  %p1693_p1 = scmp.lt.s32.totalorder %s172_s8, %s1691_s4 }
  0x2b   : > { %p1688_p4 = pnand %p1686_p6, %p1646_p2  ;;  %p1694_p10 = scmp.lt.s32.totalorder %s1692_s6, %s1685_s16 }
  0x2d   : > { %p1689_p7 = pneg %p1688_p4  ;;  %p1695_p13 = por %p1694_p10, %p1693_p1 }
  0x2f   : > { %p1696_p3 = pnand %p1695_p13, %p1689_p7 }
  0x31   : > { %1699 = shalt.err (!%p1696_p3)
}
  0x32   : > { %1586 = dma.hbm_to_vmem [thread:$0]  (!%p1880_p0), %s169_s3, 256, %s172_s8, %s158_s15  }
  0x33   : > { %180 = sbr.rel (%p1898_p5) target bundleno = 411 (0x19b), region = 28  ;;  %s1914_s25 = sand.u32 (!%p1898_p5), 1, %s1768_s10  }
  0x34   : > { %s1268_s18 = sshll.u32 (!%p1898_p5), %s1914_s25, 11  ;;  %s183_s19 = scalar_lea.sflag (!%p1898_p5), [#allocation3], %s1914_s25 }
  0x35   : > { %s1918_s20 = scalar_lea.vmem (!%p1898_p5), [#allocation2], %s1268_s18 }
  0x38   : > { %1751 = dma.done.wait (%p1853_p8), %s183_s19, 32768  }
  0x39   : > { %1753 = vsyncadd (%p1853_p8), %s183_s19, 4294934528  ;;  %s1269_s5 = sshll.u32 %s1914_s25, 4  ;;  %s192_s26 = scalar_lea.sflag [#allocation6], %s1914_s25 }
  0x3a   : > { %s1926_s27 = scalar_lea.vmem [#allocation5], %s1269_s5 }
  0x3b   : > { %1755 = dma.done.wait (%p1853_p8), %s192_s26, 256  }
  0x3c   : > { %1757 = vsyncadd (%p1853_p8), %s192_s26, 4294967040  ;;  %v487_v0 = vlaneseq  ;;  %v260_v4 = vld [vmem:[%s1918_s20 + $0xf8] sm:$0xff]  ;;  %v259_v8 = vld [vmem:[%s1918_s20 + $0xf0] sm:$0xff]  ;;  %s1270_s21 = sshll.u32 %s1914_s25, 3  ;;  %s1288_s28 = sshll.u32 %s1776_s12, 7 }
  0x3d   : > { %v292_v5 = vld [vmem:[%s1918_s20 + $0x1f8] sm:$0xff]  ;;  %1294 = vmatprep.subr.mxu0 %v260_v4  ;;  %v291_v9 = vld [vmem:[%s1918_s20 + $0x1f0] sm:$0xff]  ;;  %v258_v13 = vld [vmem:[%s1918_s20 + $0xe8] sm:$0xff]  ;;  %s220_s29 = scalar_lea.vmem [#allocation7], %s1270_s21  ;;  %s1147_s15 = scalar_lea.hbm %s2465_s2, %s1288_s28 }
  0x3e   : > { %v488_v1 = vshrl.u32 %v487_v0, 7  ;;  %v1934_v3 = vand.u32 127, %v487_v0  ;;  %v244_v6 = vld [vmem:[%s1918_s20 + $0x78] sm:$0xff]  ;;  %1329 = vmatprep.subr.mxu1 %v292_v5  ;;  %v243_v11 = vld [vmem:[%s1918_s20 + $0x70] sm:$0xff]  ;;  %v290_v16 = vld [vmem:[%s1918_s20 + $0x1e8] sm:$0xff]  ;;  %s1149_s3 = sshll.u32 %s220_s29, 4  ;;  %s1150_s3 = int_to_ptr.vmem [resolvable:$true] %s1149_s3 }
  0x3f   : > { %v276_v7 = vld [vmem:[%s1918_s20 + $0x178] sm:$0xff]  ;;  %1295 = vmatpush3.msra.mxu0 %v244_v6  ;;  %v275_v12 = vld [vmem:[%s1918_s20 + $0x170] sm:$0xff]  ;;  %v242_v17 = vld [vmem:[%s1918_s20 + $0x68] sm:$0xff]  ;;  %s1136_s16 = scalar_lea.sflag [#allocation4], %s1914_s25  ;;  %s1700_s30 = scalar_lea.vmem %s1150_s3, 128 }
  0x40   : > { %v1932_v2 = vmul.u32 256, %v488_v1  ;;  %v1943_v10 = vadd.s32 1152, %v1934_v3  ;;  %1330 = vmatpush3.msra.mxu1 %v276_v7  ;;  %v1952_v15 = vadd.s32 1024, %v1934_v3  ;;  %1296 = vmatprep.subr.mxu0 %v259_v8  ;;  %v274_v18 = vld [vmem:[%s1918_s20 + $0x168] sm:$0xff]  ;;  %v1958_v19 = vadd.s32 1408, %v1934_v3  ;;  %v257_v20 = vld [vmem:[%s1918_s20 + $0xe0] sm:$0xff]  ;;  %p1701_p8 = scmp.ne.s32.totalorder %s1150_s3, %s1700_s30 }
  0x41   : > { %1331 = vmatprep.subr.mxu1 %v291_v9  ;;  %1297 = vmatpush3.msra.mxu0 %v243_v11  ;;  %v289_v21 = vld [vmem:[%s1918_s20 + $0x1e0] sm:$0xff]  ;;  %v1969_v22 = vadd.s32 1280, %v1934_v3  ;;  %v1980_v25 = vadd.s32 1664, %v1934_v3  ;;  %v256_v26 = vld [vmem:[%s1918_s20 + $0xd8] sm:$0xff]  ;;  %v1989_v28 = vadd.s32 1920, %v1934_v3  ;;  %v1992_v29 = vadd.s32 1536, %v1934_v3 }
  0x42   : > { %v1949_v14 = vadd.s32 256, %v1932_v2  ;;  %1332 = vmatpush3.msra.mxu1 %v275_v12  ;;  %vm516_vm0 = vcmp.ge.s32.totalorder %v1943_v10, %v1932_v2  ;;  %vm515_vm2 = vcmp.ge.s32.totalorder %v1952_v15, %v1932_v2  ;;  %1298 = vmatprep.subr.mxu0 %v258_v13  ;;  %v241_v23 = vld [vmem:[%s1918_s20 + $0x60] sm:$0xff]  ;;  %v288_v27 = vld [vmem:[%s1918_s20 + $0x1d8] sm:$0xff]  ;;  %v2001_v32 = vadd.s32 1792, %v1934_v3  ;;  %v255_v33 = vld [vmem:[%s1918_s20 + $0xd0] sm:$0xff]  ;;  %p1702_p0 = pnand %p1701_p8, %p1857_p9  ;;  %s1790_s4 = smov [#allocation7]  }
  0x43   : > { %1333 = vmatprep.subr.mxu1 %v290_v16  ;;  %v273_v24 = vld [vmem:[%s1918_s20 + $0x160] sm:$0xff]  ;;  %1299 = vmatpush3.msra.mxu0 %v242_v17  ;;  %v240_v30 = vld [vmem:[%s1918_s20 + $0x58] sm:$0xff]  ;;  %v287_v34 = vld [vmem:[%s1918_s20 + $0x1d0] sm:$0xff]  ;;  %v491_v61 = vadd.s32 128, %v1934_v3  ;;  %v493_v0 = vadd.s32 384, %v1934_v3  ;;  %v492_v7 = vadd.s32 256, %v1934_v3  ;;  %vm507_vm10 = vcmp.ge.s32.totalorder %v1934_v3, %v1932_v2 }
  0x44   : > { %vm533_vm1 = vcmp.lt.s32.totalorder %v1943_v10, %v1949_v14  ;;  %vm532_vm3 = vcmp.lt.s32.totalorder %v1952_v15, %v1949_v14  ;;  %vm535_vm5 = vcmp.lt.s32.totalorder %v1958_v19, %v1949_v14  ;;  %1334 = vmatpush3.msra.mxu1 %v274_v18  ;;  %1300 = vmatprep.subr.mxu0 %v257_v20  ;;  %v272_v31 = vld [vmem:[%s1918_s20 + $0x158] sm:$0xff]  ;;  %v239_v35 = vld [vmem:[%s1918_s20 + $0x50] sm:$0xff]  ;;  %v254_v37 = vld [vmem:[%s1918_s20 + $0xc8] sm:$0xff]  ;;  %p1703_p2 = pneg %p1702_p0  ;;  %s1704_s6 = sshll.u32 %s1790_s4, 4  ;;  %s1705_s6 = int_to_ptr.vmem [resolvable:$false] %s1704_s6 }
  0x45   : > { %1335 = vmatprep.subr.mxu1 %v289_v21  ;;  %1301 = vmatpush3.msra.mxu0 %v241_v23  ;;  %v271_v36 = vld [vmem:[%s1918_s20 + $0x150] sm:$0xff]  ;;  %v286_v38 = vld [vmem:[%s1918_s20 + $0x1c8] sm:$0xff]  ;;  %v253_v41 = vld [vmem:[%s1918_s20 + $0xc0] sm:$0xff]  ;;  %vm508_vm14 = vcmp.ge.s32.totalorder %v491_v61, %v1932_v2  ;;  %vm525_vm15 = vcmp.lt.s32.totalorder %v491_v61, %v1949_v14  ;;  %vm510_vm12 = vcmp.ge.s32.totalorder %v493_v0, %v1932_v2  ;;  %s1706_s18 = scalar_lea.vmem %s1705_s6, 256  ;;  %p1707_p5 = scmp.lt.s32.totalorder %s1150_s3, %s1705_s6 }
  0x46   : > { %1336 = vmatpush3.msra.mxu1 %v273_v24  ;;  %1302 = vmatprep.subr.mxu0 %v256_v26  ;;  %v238_v39 = vld [vmem:[%s1918_s20 + $0x48] sm:$0xff]  ;;  %v285_v42 = vld [vmem:[%s1918_s20 + $0x1c0] sm:$0xff]  ;;  %v252_v45 = vld [vmem:[%s1918_s20 + $0xb8] sm:$0xff]  ;;  %vm527_vm13 = vcmp.lt.s32.totalorder %v493_v0, %v1949_v14  ;;  %vm524_vm11 = vcmp.lt.s32.totalorder %v1934_v3, %v1949_v14  ;;  %vm509_vm9 = vcmp.ge.s32.totalorder %v492_v7, %v1932_v2  ;;  %p1708_p6 = scmp.lt.s32.totalorder %s1706_s18, %s1700_s30 }
  0x47   : > { %1337 = vmatprep.subr.mxu1 %v288_v27  ;;  %1303 = vmatpush3.msra.mxu0 %v240_v30  ;;  %v270_v40 = vld [vmem:[%s1918_s20 + $0x148] sm:$0xff]  ;;  %v237_v43 = vld [vmem:[%s1918_s20 + $0x40] sm:$0xff]  ;;  %v284_v46 = vld [vmem:[%s1918_s20 + $0x1b8] sm:$0xff]  ;;  %vm526_vm6 = vcmp.lt.s32.totalorder %v492_v7, %v1949_v14 }
  0x48   : > { %1338 = vmatpush3.msra.mxu1 %v272_v31  ;;  %1304 = vmatprep.subr.mxu0 %v255_v33  ;;  %v269_v44 = vld [vmem:[%s1918_s20 + $0x140] sm:$0xff]  ;;  %v236_v47 = vld [vmem:[%s1918_s20 + $0x38] sm:$0xff]  ;;  %v251_v49 = vld [vmem:[%s1918_s20 + $0xb0] sm:$0xff]  ;;  %p1709_p4 = por %p1708_p6, %p1707_p5 }
  0x49   : > { %1339 = vmatprep.subr.mxu1 %v287_v34  ;;  %1305 = vmatpush3.msra.mxu0 %v239_v35  ;;  %v268_v48 = vld [vmem:[%s1918_s20 + $0x138] sm:$0xff]  ;;  %v283_v50 = vld [vmem:[%s1918_s20 + $0x1b0] sm:$0xff]  ;;  %v250_v53 = vld [vmem:[%s1918_s20 + $0xa8] sm:$0xff] }
  0x4a   : > { %1340 = vmatpush3.msra.mxu1 %v271_v36  ;;  %1306 = vmatprep.subr.mxu0 %v254_v37  ;;  %v235_v51 = vld [vmem:[%s1918_s20 + $0x30] sm:$0xff]  ;;  %v282_v54 = vld [vmem:[%s1918_s20 + $0x1a8] sm:$0xff]  ;;  %v249_v57 = vld [vmem:[%s1918_s20 + $0xa0] sm:$0xff]  ;;  %p1710_p7 = pnand %p1709_p4, %p1703_p2 }
  0x4b   : > { %1341 = vmatprep.subr.mxu1 %v286_v38  ;;  %1307 = vmatpush3.msra.mxu0 %v238_v39  ;;  %v267_v52 = vld [vmem:[%s1918_s20 + $0x130] sm:$0xff]  ;;  %v234_v55 = vld [vmem:[%s1918_s20 + $0x28] sm:$0xff]  ;;  %v281_v58 = vld [vmem:[%s1918_s20 + $0x1a0] sm:$0xff] }
  0x4c   : > { %1342 = vmatpush3.msra.mxu1 %v270_v40  ;;  %1308 = vmatprep.subr.mxu0 %v253_v41  ;;  %v266_v56 = vld [vmem:[%s1918_s20 + $0x128] sm:$0xff]  ;;  %v233_v59 = vld [vmem:[%s1918_s20 + $0x20] sm:$0xff]  ;;  %v248_v62 = vld [vmem:[%s1918_s20 + $0x98] sm:$0xff] }
  0x4d   : > { %1343 = vmatprep.subr.mxu1 %v285_v42  ;;  %1309 = vmatpush3.msra.mxu0 %v237_v43  ;;  %v265_v60 = vld [vmem:[%s1918_s20 + $0x120] sm:$0xff]  ;;  %v280_v63 = vld [vmem:[%s1918_s20 + $0x198] sm:$0xff]  ;;  %v247_v5 = vld [vmem:[%s1918_s20 + $0x90] sm:$0xff] }
  0x4e   : > { %1344 = vmatpush3.msra.mxu1 %v269_v44  ;;  %1310 = vmatprep.subr.mxu0 %v252_v45  ;;  %v232_v1 = vld [vmem:[%s1918_s20 + $0x18] sm:$0xff]  ;;  %v279_v6 = vld [vmem:[%s1918_s20 + $0x190] sm:$0xff]  ;;  %v246_v11 = vld [vmem:[%s1918_s20 + $0x88] sm:$0xff] }
  0x4f   : > { %1345 = vmatprep.subr.mxu1 %v284_v46  ;;  %1311 = vmatpush3.msra.mxu0 %v236_v47  ;;  %v264_v4 = vld [vmem:[%s1918_s20 + $0x118] sm:$0xff]  ;;  %v231_v8 = vld [vmem:[%s1918_s20 + $0x10] sm:$0xff]  ;;  %v278_v12 = vld [vmem:[%s1918_s20 + $0x188] sm:$0xff] }
  0x50   : > { %1346 = vmatpush3.msra.mxu1 %v268_v48  ;;  %1312 = vmatprep.subr.mxu0 %v251_v49  ;;  %v263_v9 = vld [vmem:[%s1918_s20 + $0x110] sm:$0xff]  ;;  %v230_v13 = vld [vmem:[%s1918_s20 + $0x8] sm:$0xff]  ;;  %v245_v17 = vld [vmem:[%s1918_s20 + $0x80] sm:$0xff] }
  0x51   : > { %1347 = vmatprep.subr.mxu1 %v283_v50  ;;  %1313 = vmatpush3.msra.mxu0 %v235_v51  ;;  %v262_v16 = vld [vmem:[%s1918_s20 + $0x108] sm:$0xff]  ;;  %v277_v18 = vld [vmem:[%s1918_s20 + $0x180] sm:$0xff]  ;;  %vm2072_vm8 = vmand %vm508_vm14, %vm525_vm15 }
  0x52   : > { %1348 = vmatpush3.msra.mxu1 %v267_v52  ;;  %1314 = vmatprep.subr.mxu0 %v250_v53  ;;  %v229_v21 = vld [vmem:[%s1918_s20] sm:$0xff]  ;;  %v2080_v23 = vld [vmem:[%s1926_s27 + $0x8] sm:$0xff]  ;;  %vm543_vm14 = vmand %vm510_vm12, %vm527_vm13 }
  0x53   : > { %1349 = vmatprep.subr.mxu1 %v282_v54  ;;  %1315 = vmatpush3.msra.mxu0 %v234_v55  ;;  %v261_v24 = vld [vmem:[%s1918_s20 + $0x100] sm:$0xff]  ;;  %vm540_vm15 = vmand %vm507_vm10, %vm524_vm11  ;;  %v324_v27 = vld [vmem:[%s1918_s20 + $0x2f8] sm:$0xff] }
  0x54   : > { %1350 = vmatpush3.msra.mxu1 %v266_v56  ;;  %1316 = vmatprep.subr.mxu0 %v249_v57  ;;  %v2094_v26 = vld [vmem:[%s1926_s27] sm:$0xff]  ;;  %vm542_vm7 = vmand %vm509_vm9, %vm526_vm6  ;;  %v356_v30 = vld [vmem:[%s1918_s20 + $0x3f8] sm:$0xff] }
  0x55   : > { %1351 = vmatprep.subr.mxu1 %v281_v58  ;;  %1317 = vmatpush3.msra.mxu0 %v233_v59  ;;  %v308_v31 = vld [vmem:[%s1918_s20 + $0x278] sm:$0xff]  ;;  %v323_v34 = vld [vmem:[%s1918_s20 + $0x2f0] sm:$0xff]  ;;  %v322_v38 = vld [vmem:[%s1918_s20 + $0x2e8] sm:$0xff] }
  0x56   : > { %1352 = vmatpush3.msra.mxu1 %v265_v60  ;;  %1318 = vmatprep.subr.mxu0 %v248_v62  ;;  %v340_v33 = vld [vmem:[%s1918_s20 + $0x378] sm:$0xff]  ;;  %v355_v35 = vld [vmem:[%s1918_s20 + $0x3f0] sm:$0xff]  ;;  %v354_v39 = vld [vmem:[%s1918_s20 + $0x3e8] sm:$0xff] }
  0x57   : > { %1353 = vmatprep.subr.mxu1 %v280_v63  ;;  %1319 = vmatpush3.msra.mxu0 %v232_v1  ;;  %v307_v36 = vld [vmem:[%s1918_s20 + $0x270] sm:$0xff]  ;;  %v306_v40 = vld [vmem:[%s1918_s20 + $0x268] sm:$0xff]  ;;  %v321_v42 = vld [vmem:[%s1918_s20 + $0x2e0] sm:$0xff] }
  0x58   : > { %1354 = vmatpush3.msra.mxu1 %v264_v4  ;;  %1320 = vmatprep.subr.mxu0 %v247_v5  ;;  %v339_v37 = vld [vmem:[%s1918_s20 + $0x370] sm:$0xff]  ;;  %v338_v41 = vld [vmem:[%s1918_s20 + $0x368] sm:$0xff]  ;;  %v353_v43 = vld [vmem:[%s1918_s20 + $0x3e0] sm:$0xff] }
  0x59   : > { %1355 = vmatprep.subr.mxu1 %v279_v6  ;;  %1321 = vmatpush3.msra.mxu0 %v231_v8  ;;  %v305_v44 = vld [vmem:[%s1918_s20 + $0x260] sm:$0xff]  ;;  %v320_v46 = vld [vmem:[%s1918_s20 + $0x2d8] sm:$0xff]  ;;  %v319_v50 = vld [vmem:[%s1918_s20 + $0x2d0] sm:$0xff] }
  0x5a   : > { %1356 = vmatpush3.msra.mxu1 %v263_v9  ;;  %1322 = vmatprep.subr.mxu0 %v246_v11  ;;  %v337_v45 = vld [vmem:[%s1918_s20 + $0x360] sm:$0xff]  ;;  %v352_v47 = vld [vmem:[%s1918_s20 + $0x3d8] sm:$0xff]  ;;  %v351_v51 = vld [vmem:[%s1918_s20 + $0x3d0] sm:$0xff] }
  0x5b   : > { %1357 = vmatprep.subr.mxu1 %v278_v12  ;;  %1323 = vmatpush3.msra.mxu0 %v230_v13  ;;  %v304_v48 = vld [vmem:[%s1918_s20 + $0x258] sm:$0xff]  ;;  %v303_v52 = vld [vmem:[%s1918_s20 + $0x250] sm:$0xff]  ;;  %v318_v54 = vld [vmem:[%s1918_s20 + $0x2c8] sm:$0xff] }
  0x5c   : > { %1358 = vmatpush3.msra.mxu1 %v262_v16  ;;  %1324 = vmatprep.subr.mxu0 %v245_v17  ;;  %v336_v49 = vld [vmem:[%s1918_s20 + $0x358] sm:$0xff]  ;;  %v335_v53 = vld [vmem:[%s1918_s20 + $0x350] sm:$0xff]  ;;  %v350_v55 = vld [vmem:[%s1918_s20 + $0x3c8] sm:$0xff] }
  0x5d   : > { %1359 = vmatprep.subr.mxu1 %v277_v18  ;;  %1325 = vmatpush3.msra.mxu0 %v229_v21  ;;  %v302_v56 = vld [vmem:[%s1918_s20 + $0x248] sm:$0xff]  ;;  %v317_v58 = vld [vmem:[%s1918_s20 + $0x2c0] sm:$0xff]  ;;  %v316_v62 = vld [vmem:[%s1918_s20 + $0x2b8] sm:$0xff] }
  0x5e   : > { %1271 = vmatprep.mubr.msk.f32.mxu0 %vm2072_vm8, %v2080_v23  ;;  %1360 = vmatpush3.msra.mxu1 %v261_v24  ;;  %v334_v57 = vld [vmem:[%s1918_s20 + $0x348] sm:$0xff]  ;;  %v349_v59 = vld [vmem:[%s1918_s20 + $0x3c0] sm:$0xff]  ;;  %v348_v63 = vld [vmem:[%s1918_s20 + $0x3b8] sm:$0xff]  ;;  %v495_v24 = vadd.s32 640, %v1934_v3 }
  0x5f   : > { %1273 = vmatprep.mubr.msk.f32.mxu1 %vm543_vm14, %v2080_v23  ;;  %1272 = vmatmul.mubr.msk.f32.vlgmr.msra.gmra.mxu0 %vm540_vm15, %v2094_v26  ;;  %v301_v60 = vld [vmem:[%s1918_s20 + $0x240] sm:$0xff]  ;;  %v300_v0 = vld [vmem:[%s1918_s20 + $0x238] sm:$0xff]  ;;  %v315_v4 = vld [vmem:[%s1918_s20 + $0x2b0] sm:$0xff] }
  0x60   : > { %1274 = vmatmul.mubr.msk.f32.vlgmr.msra.gmra.mxu1 %vm542_vm7, %v2094_v26  ;;  %1364 = vmatprep.subr.mxu0 %v324_v27  ;;  %v333_v61 = vld [vmem:[%s1918_s20 + $0x340] sm:$0xff]  ;;  %v332_v1 = vld [vmem:[%s1918_s20 + $0x338] sm:$0xff]  ;;  %v347_v5 = vld [vmem:[%s1918_s20 + $0x3b0] sm:$0xff]  ;;  %vm512_vm6 = vcmp.ge.s32.totalorder %v495_v24, %v1932_v2  ;;  %vm529_vm7 = vcmp.lt.s32.totalorder %v495_v24, %v1949_v14 }
  0x61   : > { %1399 = vmatprep.subr.mxu1 %v356_v30  ;;  %1365 = vmatpush3.msra.mxu0 %v308_v31  ;;  %v299_v6 = vld [vmem:[%s1918_s20 + $0x230] sm:$0xff]  ;;  %v314_v8 = vld [vmem:[%s1918_s20 + $0x2a8] sm:$0xff]  ;;  %v313_v13 = vld [vmem:[%s1918_s20 + $0x2a0] sm:$0xff]  ;;  %v494_v31 = vadd.s32 512, %v1934_v3 }
  0x62   : > { %1400 = vmatpush3.msra.mxu1 %v340_v33  ;;  %1366 = vmatprep.subr.mxu0 %v323_v34  ;;  %v331_v7 = vld [vmem:[%s1918_s20 + $0x330] sm:$0xff]  ;;  %v346_v9 = vld [vmem:[%s1918_s20 + $0x3a8] sm:$0xff]  ;;  %v345_v16 = vld [vmem:[%s1918_s20 + $0x3a0] sm:$0xff] }
  0x63   : > { %1401 = vmatprep.subr.mxu1 %v355_v35  ;;  %1367 = vmatpush3.msra.mxu0 %v307_v36  ;;  %v298_v11 = vld [vmem:[%s1918_s20 + $0x228] sm:$0xff]  ;;  %v297_v17 = vld [vmem:[%s1918_s20 + $0x220] sm:$0xff]  ;;  %v312_v20 = vld [vmem:[%s1918_s20 + $0x298] sm:$0xff]  ;;  %v497_v35 = vadd.s32 896, %v1934_v3  ;;  %vm511_vm8 = vcmp.ge.s32.totalorder %v494_v31, %v1932_v2  ;;  %vm528_vm9 = vcmp.lt.s32.totalorder %v494_v31, %v1949_v14 }
  0x64   : > { %1402 = vmatpush3.msra.mxu1 %v339_v37  ;;  %1368 = vmatprep.subr.mxu0 %v322_v38  ;;  %v330_v12 = vld [vmem:[%s1918_s20 + $0x328] sm:$0xff]  ;;  %v329_v18 = vld [vmem:[%s1918_s20 + $0x320] sm:$0xff]  ;;  %v344_v21 = vld [vmem:[%s1918_s20 + $0x398] sm:$0xff]  ;;  %v496_v38 = vadd.s32 768, %v1934_v3 }
  0x65   : > { %1403 = vmatprep.subr.mxu1 %v354_v39  ;;  %1369 = vmatpush3.msra.mxu0 %v306_v40  ;;  %v296_v27 = vld [vmem:[%s1918_s20 + $0x218] sm:$0xff]  ;;  %v311_v33 = vld [vmem:[%s1918_s20 + $0x290] sm:$0xff]  ;;  %v310_v39 = vld [vmem:[%s1918_s20 + $0x288] sm:$0xff]  ;;  %vm514_vm10 = vcmp.ge.s32.totalorder %v497_v35, %v1932_v2  ;;  %vm531_vm11 = vcmp.lt.s32.totalorder %v497_v35, %v1949_v14 }
  0x66   : > { %1404 = vmatpush3.msra.mxu1 %v338_v41  ;;  %1370 = vmatprep.subr.mxu0 %v321_v42  ;;  %v328_v30 = vld [vmem:[%s1918_s20 + $0x318] sm:$0xff]  ;;  %v343_v34 = vld [vmem:[%s1918_s20 + $0x390] sm:$0xff]  ;;  %v342_v40 = vld [vmem:[%s1918_s20 + $0x388] sm:$0xff]  ;;  %vm513_vm13 = vcmp.ge.s32.totalorder %v496_v38, %v1932_v2  ;;  %vm530_vm14 = vcmp.lt.s32.totalorder %v496_v38, %v1949_v14 }
  0x67   : > { %1405 = vmatprep.subr.mxu1 %v353_v43  ;;  %1371 = vmatpush3.msra.mxu0 %v305_v44  ;;  %v295_v36 = vld [vmem:[%s1918_s20 + $0x210] sm:$0xff]  ;;  %v294_v41 = vld [vmem:[%s1918_s20 + $0x208] sm:$0xff]  ;;  %v309_v3 = vld [vmem:[%s1918_s20 + $0x280] sm:$0xff] }
  0x68   : > { %1406 = vmatpush3.msra.mxu1 %v337_v45  ;;  %1372 = vmatprep.subr.mxu0 %v320_v46  ;;  %v327_v37 = vld [vmem:[%s1918_s20 + $0x310] sm:$0xff]  ;;  %v326_v42 = vld [vmem:[%s1918_s20 + $0x308] sm:$0xff]  ;;  %v341_v43 = vld [vmem:[%s1918_s20 + $0x380] sm:$0xff] }
  0x69   : > { %1407 = vmatprep.subr.mxu1 %v352_v47  ;;  %1373 = vmatpush3.msra.mxu0 %v304_v48  ;;  %v293_v44 = vld [vmem:[%s1918_s20 + $0x200] sm:$0xff]  ;;  %vm545_vm12 = vmand %vm512_vm6, %vm529_vm7  ;;  %v388_v46 = vld [vmem:[%s1918_s20 + $0x4f8] sm:$0xff] }
  0x6a   : > { %1408 = vmatpush3.msra.mxu1 %v336_v49  ;;  %1374 = vmatprep.subr.mxu0 %v319_v50  ;;  %v325_v45 = vld [vmem:[%s1918_s20 + $0x300] sm:$0xff]  ;;  %vm544_vm15 = vmand %vm511_vm8, %vm528_vm9  ;;  %v420_v47 = vld [vmem:[%s1918_s20 + $0x5f8] sm:$0xff]  ;;  %vm2486_vm9 = vcmp.ge.s32.totalorder %v1980_v25, %v1932_v2 }
  0x6b   : > { %1409 = vmatprep.subr.mxu1 %v351_v51  ;;  %1375 = vmatpush3.msra.mxu0 %v303_v52  ;;  %vm547_vm4 = vmand %vm514_vm10, %vm531_vm11  ;;  %v372_v48 = vld [vmem:[%s1918_s20 + $0x478] sm:$0xff]  ;;  %v387_v51 = vld [vmem:[%s1918_s20 + $0x4f0] sm:$0xff]  ;;  %vm2489_vm11 = vcmp.lt.s32.totalorder %v1989_v28, %v1949_v14 }
  0x6c   : > { %1410 = vmatpush3.msra.mxu1 %v335_v53  ;;  %1376 = vmatprep.subr.mxu0 %v318_v54  ;;  %vm546_vm6 = vmand %vm513_vm13, %vm530_vm14  ;;  %v404_v49 = vld [vmem:[%s1918_s20 + $0x578] sm:$0xff]  ;;  %v419_v52 = vld [vmem:[%s1918_s20 + $0x5f0] sm:$0xff]  ;;  %vm2493_vm14 = vcmp.lt.s32.totalorder %v1992_v29, %v1949_v14 }
  0x6d   : > { %1411 = vmatprep.subr.mxu1 %v350_v55  ;;  %1377 = vmatpush3.msra.mxu0 %v302_v56  ;;  %vm2198_vm7 = vmand %vm516_vm0, %vm533_vm1  ;;  %v371_v10 = vld [vmem:[%s1918_s20 + $0x470] sm:$0xff]  ;;  %vm2478_vm0 = vcmp.ge.s32.totalorder %v1958_v19, %v1932_v2  ;;  %v386_v15 = vld [vmem:[%s1918_s20 + $0x4e8] sm:$0xff] }
  0x6e   : > { %1412 = vmatpush3.msra.mxu1 %v334_v57  ;;  %1378 = vmatprep.subr.mxu0 %v317_v58  ;;  %vm2211_vm8 = vmand %vm515_vm2, %vm532_vm3  ;;  %v403_v54 = vld [vmem:[%s1918_s20 + $0x570] sm:$0xff]  ;;  %v418_v56 = vld [vmem:[%s1918_s20 + $0x5e8] sm:$0xff]  ;;  %vm2481_vm2 = vcmp.lt.s32.totalorder %v1969_v22, %v1949_v14  ;;  %vm2482_vm3 = vcmp.ge.s32.totalorder %v1969_v22, %v1932_v2 }
  0x6f   : > { %1413 = vmatprep.subr.mxu1 %v349_v59  ;;  %1379 = vmatpush3.msra.mxu0 %v301_v60  ;;  %vm2224_vm1 = vmand %vm2478_vm0, %vm535_vm5  ;;  %v370_v19 = vld [vmem:[%s1918_s20 + $0x468] sm:$0xff]  ;;  %v385_v59 = vld [vmem:[%s1918_s20 + $0x4e0] sm:$0xff]  ;;  %vm2485_vm5 = vcmp.lt.s32.totalorder %v1980_v25, %v1949_v14  ;;  %vm2497_vm0 = vcmp.lt.s32.totalorder %v2001_v32, %v1949_v14 }
  0x70   : > { %1414 = vmatpush3.msra.mxu1 %v333_v61  ;;  %1380 = vmatprep.subr.mxu0 %v316_v62  ;;  %v402_v58 = vld [vmem:[%s1918_s20 + $0x568] sm:$0xff]  ;;  %v417_v60 = vld [vmem:[%s1918_s20 + $0x5e0] sm:$0xff]  ;;  %v384_v62 = vld [vmem:[%s1918_s20 + $0x4d8] sm:$0xff] }
  0x71   : > { %1415 = vmatprep.subr.mxu1 %v348_v63  ;;  %1381 = vmatpush3.msra.mxu0 %v300_v0  ;;  %v369_v22 = vld [vmem:[%s1918_s20 + $0x460] sm:$0xff]  ;;  %v416_v63 = vld [vmem:[%s1918_s20 + $0x5d8] sm:$0xff]  ;;  %v411_v31 = vld [vmem:[%s1918_s20 + $0x5b0] sm:$0xff] }
  0x72   : > { %1416 = vmatpush3.msra.mxu1 %v332_v1  ;;  %1382 = vmatprep.subr.mxu0 %v315_v4  ;;  %v401_v61 = vld [vmem:[%s1918_s20 + $0x560] sm:$0xff]  ;;  %v368_v0 = vld [vmem:[%s1918_s20 + $0x458] sm:$0xff]  ;;  %v383_v4 = vld [vmem:[%s1918_s20 + $0x4d0] sm:$0xff] }
  0x73   : > { %1417 = vmatprep.subr.mxu1 %v347_v5  ;;  %1383 = vmatpush3.msra.mxu0 %v299_v6  ;;  %v400_v1 = vld [vmem:[%s1918_s20 + $0x558] sm:$0xff]  ;;  %v415_v5 = vld [vmem:[%s1918_s20 + $0x5d0] sm:$0xff]  ;;  %v378_v35 = vld [vmem:[%s1918_s20 + $0x4a8] sm:$0xff] }
  0x74   : > { %1418 = vmatpush3.msra.mxu1 %v331_v7  ;;  %1384 = vmatprep.subr.mxu0 %v314_v8  ;;  %v367_v6 = vld [vmem:[%s1918_s20 + $0x450] sm:$0xff]  ;;  %v382_v8 = vld [vmem:[%s1918_s20 + $0x4c8] sm:$0xff]  ;;  %v364_v24 = vld [vmem:[%s1918_s20 + $0x438] sm:$0xff] }
  0x75   : > { %1419 = vmatprep.subr.mxu1 %v346_v9  ;;  %1385 = vmatpush3.msra.mxu0 %v298_v11  ;;  %v399_v7 = vld [vmem:[%s1918_s20 + $0x550] sm:$0xff]  ;;  %v414_v9 = vld [vmem:[%s1918_s20 + $0x5c8] sm:$0xff]  ;;  %vm2284_vm10 = vmand %vm2486_vm9, %vm2485_vm5 }
  0x76   : > { %1420 = vmatpush3.msra.mxu1 %v330_v12  ;;  %1386 = vmatprep.subr.mxu0 %v313_v13  ;;  %v366_v11 = vld [vmem:[%s1918_s20 + $0x448] sm:$0xff]  ;;  %v381_v13 = vld [vmem:[%s1918_s20 + $0x4c0] sm:$0xff]  ;;  %v360_v25 = vld [vmem:[%s1918_s20 + $0x418] sm:$0xff] }
  0x77   : > { %1421 = vmatprep.subr.mxu1 %v345_v16  ;;  %1387 = vmatpush3.msra.mxu0 %v297_v17  ;;  %v398_v12 = vld [vmem:[%s1918_s20 + $0x548] sm:$0xff]  ;;  %v413_v16 = vld [vmem:[%s1918_s20 + $0x5c0] sm:$0xff]  ;;  %v483_v50 = vld [vmem:[%s1918_s20 + $0x7f0] sm:$0xff] }
  0x78   : > { %1422 = vmatpush3.msra.mxu1 %v329_v18  ;;  %1388 = vmatprep.subr.mxu0 %v312_v20  ;;  %v365_v17 = vld [vmem:[%s1918_s20 + $0x440] sm:$0xff]  ;;  %v380_v20 = vld [vmem:[%s1918_s20 + $0x4b8] sm:$0xff]  ;;  %v394_v38 = vld [vmem:[%s1918_s20 + $0x528] sm:$0xff] }
  0x79   : > { %1423 = vmatprep.subr.mxu1 %v344_v21  ;;  %1389 = vmatpush3.msra.mxu0 %v296_v27  ;;  %v397_v18 = vld [vmem:[%s1918_s20 + $0x540] sm:$0xff]  ;;  %v412_v21 = vld [vmem:[%s1918_s20 + $0x5b8] sm:$0xff]  ;;  %v390_v14 = vld [vmem:[%s1918_s20 + $0x508] sm:$0xff] }
  0x7a   : > { %1424 = vmatpush3.msra.mxu1 %v328_v30  ;;  %1390 = vmatprep.subr.mxu0 %v311_v33  ;;  %v396_v27 = vld [vmem:[%s1918_s20 + $0x538] sm:$0xff]  ;;  %v379_v30 = vld [vmem:[%s1918_s20 + $0x4b0] sm:$0xff]  ;;  %v482_v55 = vld [vmem:[%s1918_s20 + $0x7e8] sm:$0xff] }
  0x7b   : > { %1425 = vmatprep.subr.mxu1 %v343_v34  ;;  %1391 = vmatpush3.msra.mxu0 %v295_v36  ;;  %v363_v33 = vld [vmem:[%s1918_s20 + $0x430] sm:$0xff]  ;;  %v410_v36 = vld [vmem:[%s1918_s20 + $0x5a8] sm:$0xff]  ;;  %v449_v57 = vld [vmem:[%s1918_s20 + $0x6e0] sm:$0xff] }
  0x7c   : > { %1426 = vmatpush3.msra.mxu1 %v327_v37  ;;  %1392 = vmatprep.subr.mxu0 %v310_v39  ;;  %v395_v34 = vld [vmem:[%s1918_s20 + $0x530] sm:$0xff]  ;;  %v362_v37 = vld [vmem:[%s1918_s20 + $0x428] sm:$0xff]  ;;  %v377_v39 = vld [vmem:[%s1918_s20 + $0x4a0] sm:$0xff] }
  0x7d   : > { %1427 = vmatprep.subr.mxu1 %v342_v40  ;;  %1393 = vmatpush3.msra.mxu0 %v294_v41  ;;  %v409_v40 = vld [vmem:[%s1918_s20 + $0x5a0] sm:$0xff]  ;;  %v435_v53 = vld [vmem:[%s1918_s20 + $0x670] sm:$0xff] }
  0x7e   : > { %1428 = vmatpush3.msra.mxu1 %v326_v42  ;;  %1394 = vmatprep.subr.mxu0 %v309_v3  ;;  %v361_v41 = vld [vmem:[%s1918_s20 + $0x420] sm:$0xff] }
  0x7f   : > { %1429 = vmatprep.subr.mxu1 %v341_v43  ;;  %1395 = vmatpush3.msra.mxu0 %v293_v44  ;;  %v393_v42 = vld [vmem:[%s1918_s20 + $0x520] sm:$0xff]  ;;  %v376_v43 = vld [vmem:[%s1918_s20 + $0x498] sm:$0xff] }
  0x80   : > { %1275 = vmatprep.mubr.msk.f32.mxu0 %vm545_vm12, %v2080_v23  ;;  %1430 = vmatpush3.msra.mxu1 %v325_v45  ;;  %v408_v44 = vld [vmem:[%s1918_s20 + $0x598] sm:$0xff]  ;;  %vm2490_vm12 = vcmp.ge.s32.totalorder %v1989_v28, %v1932_v2  ;;  %v375_v28 = vld [vmem:[%s1918_s20 + $0x490] sm:$0xff] }
  0x81   : > { %1276 = vmatmul.mubr.msk.f32.vlgmr.msra.gmra.mxu0 %vm544_vm15, %v2094_v26  ;;  %1277 = vmatprep.mubr.msk.f32.mxu1 %vm547_vm4, %v2080_v23  ;;  %vm2236_vm4 = vmand %vm2482_vm3, %vm2481_vm2  ;;  %vm2494_vm15 = vcmp.ge.s32.totalorder %v1992_v29, %v1932_v2  ;;  %vm2498_vm2 = vcmp.ge.s32.totalorder %v2001_v32, %v1932_v2  ;;  %v359_v29 = vld [vmem:[%s1918_s20 + $0x410] sm:$0xff]  ;;  %v358_v2 = vld [vmem:[%s1918_s20 + $0x408] sm:$0xff] }
  0x82   : > { %1434 = vmatprep.subr.mxu0 %v388_v46  ;;  %1469 = vmatprep.subr.mxu1 %v420_v47  ;;  %vm2296_vm13 = vmand %vm2490_vm12, %vm2489_vm11  ;;  %v392_v46 = vld [vmem:[%s1918_s20 + $0x518] sm:$0xff]  ;;  %v373_v32 = vld [vmem:[%s1918_s20 + $0x480] sm:$0xff] }
  0x83   : > { %1278 = vmatmul.mubr.msk.f32.vlgmr.msra.gmra.mxu1 %vm546_vm6, %v2094_v26  ;;  %1435 = vmatpush3.msra.mxu0 %v372_v48  ;;  %vm2308_vm6 = vmand %vm2494_vm15, %vm2493_vm14  ;;  %v407_v48 = vld [vmem:[%s1918_s20 + $0x590] sm:$0xff] }
  0x84   : > { %1470 = vmatpush3.msra.mxu1 %v404_v49  ;;  %1436 = vmatprep.subr.mxu0 %v387_v51  ;;  %vm2320_vm3 = vmand %vm2498_vm2, %vm2497_vm0  ;;  %v391_v51 = vld [vmem:[%s1918_s20 + $0x510] sm:$0xff] }
  0x85   : > { %1471 = vmatprep.subr.mxu1 %v419_v52  ;;  %1437 = vmatpush3.msra.mxu0 %v371_v10  ;;  %v374_v52 = vld [vmem:[%s1918_s20 + $0x488] sm:$0xff] }
  0x86   : > { %1472 = vmatpush3.msra.mxu1 %v403_v54  ;;  %1438 = vmatprep.subr.mxu0 %v386_v15  ;;  %v406_v10 = vld [vmem:[%s1918_s20 + $0x588] sm:$0xff]  ;;  %v405_v54 = vld [vmem:[%s1918_s20 + $0x580] sm:$0xff] }
  0x87   : > { %1473 = vmatprep.subr.mxu1 %v418_v56  ;;  %1439 = vmatpush3.msra.mxu0 %v370_v19  ;;  %v357_v15 = vld [vmem:[%s1918_s20 + $0x400] sm:$0xff]  ;;  %v452_v19 = vld [vmem:[%s1918_s20 + $0x6f8] sm:$0xff] }
  0x88   : > { %1474 = vmatpush3.msra.mxu1 %v402_v58  ;;  %1440 = vmatprep.subr.mxu0 %v385_v59  ;;  %v389_v56 = vld [vmem:[%s1918_s20 + $0x500] sm:$0xff]  ;;  %v484_v58 = vld [vmem:[%s1918_s20 + $0x7f8] sm:$0xff] }
  0x89   : > { %1475 = vmatprep.subr.mxu1 %v417_v60  ;;  %1441 = vmatpush3.msra.mxu0 %v369_v22  ;;  %v436_v59 = vld [vmem:[%s1918_s20 + $0x678] sm:$0xff]  ;;  %v451_v22 = vld [vmem:[%s1918_s20 + $0x6f0] sm:$0xff] }
  0x8a   : > { %1476 = vmatpush3.msra.mxu1 %v401_v61  ;;  %1442 = vmatprep.subr.mxu0 %v384_v62  ;;  %v468_v60 = vld [vmem:[%s1918_s20 + $0x778] sm:$0xff]  ;;  %v467_v61 = vld [vmem:[%s1918_s20 + $0x770] sm:$0xff]  ;;  %v450_v62 = vld [vmem:[%s1918_s20 + $0x6e8] sm:$0xff] }
  0x8b   : > { %1477 = vmatprep.subr.mxu1 %v416_v63  ;;  %1443 = vmatpush3.msra.mxu0 %v368_v0  ;;  %v434_v63 = vld [vmem:[%s1918_s20 + $0x668] sm:$0xff] }
  0x8c   : > { %1478 = vmatpush3.msra.mxu1 %v400_v1  ;;  %1444 = vmatprep.subr.mxu0 %v383_v4  ;;  %v466_v0 = vld [vmem:[%s1918_s20 + $0x768] sm:$0xff]  ;;  %v481_v1 = vld [vmem:[%s1918_s20 + $0x7e0] sm:$0xff] }
  0x8d   : > { %1479 = vmatprep.subr.mxu1 %v415_v5  ;;  %1445 = vmatpush3.msra.mxu0 %v367_v6  ;;  %v433_v4 = vld [vmem:[%s1918_s20 + $0x660] sm:$0xff]  ;;  %v448_v6 = vld [vmem:[%s1918_s20 + $0x6d8] sm:$0xff] }
  0x8e   : > { %1480 = vmatpush3.msra.mxu1 %v399_v7  ;;  %1446 = vmatprep.subr.mxu0 %v382_v8  ;;  %v465_v5 = vld [vmem:[%s1918_s20 + $0x760] sm:$0xff]  ;;  %v480_v7 = vld [vmem:[%s1918_s20 + $0x7d8] sm:$0xff] }
  0x8f   : > { %1481 = vmatprep.subr.mxu1 %v414_v9  ;;  %1447 = vmatpush3.msra.mxu0 %v366_v11  ;;  %v432_v8 = vld [vmem:[%s1918_s20 + $0x658] sm:$0xff]  ;;  %v447_v11 = vld [vmem:[%s1918_s20 + $0x6d0] sm:$0xff] }
  0x90   : > { %1482 = vmatpush3.msra.mxu1 %v398_v12  ;;  %1448 = vmatprep.subr.mxu0 %v381_v13  ;;  %v464_v9 = vld [vmem:[%s1918_s20 + $0x758] sm:$0xff]  ;;  %v479_v12 = vld [vmem:[%s1918_s20 + $0x7d0] sm:$0xff] }
  0x91   : > { %1483 = vmatprep.subr.mxu1 %v413_v16  ;;  %1449 = vmatpush3.msra.mxu0 %v365_v17  ;;  %v431_v13 = vld [vmem:[%s1918_s20 + $0x650] sm:$0xff]  ;;  %v446_v17 = vld [vmem:[%s1918_s20 + $0x6c8] sm:$0xff] }
  0x92   : > { %1484 = vmatpush3.msra.mxu1 %v397_v18  ;;  %1450 = vmatprep.subr.mxu0 %v380_v20  ;;  %v463_v16 = vld [vmem:[%s1918_s20 + $0x750] sm:$0xff]  ;;  %v478_v18 = vld [vmem:[%s1918_s20 + $0x7c8] sm:$0xff] }
  0x93   : > { %1485 = vmatprep.subr.mxu1 %v412_v21  ;;  %1451 = vmatpush3.msra.mxu0 %v364_v24  ;;  %v430_v20 = vld [vmem:[%s1918_s20 + $0x648] sm:$0xff]  ;;  %v445_v24 = vld [vmem:[%s1918_s20 + $0x6c0] sm:$0xff] }
  0x94   : > { %1486 = vmatpush3.msra.mxu1 %v396_v27  ;;  %1452 = vmatprep.subr.mxu0 %v379_v30  ;;  %v462_v21 = vld [vmem:[%s1918_s20 + $0x748] sm:$0xff]  ;;  %v477_v27 = vld [vmem:[%s1918_s20 + $0x7c0] sm:$0xff] }
  0x95   : > { %1487 = vmatprep.subr.mxu1 %v411_v31  ;;  %1453 = vmatpush3.msra.mxu0 %v363_v33  ;;  %v429_v30 = vld [vmem:[%s1918_s20 + $0x640] sm:$0xff]  ;;  %v444_v33 = vld [vmem:[%s1918_s20 + $0x6b8] sm:$0xff] }
  0x96   : > { %1488 = vmatpush3.msra.mxu1 %v395_v34  ;;  %1454 = vmatprep.subr.mxu0 %v378_v35  ;;  %v461_v31 = vld [vmem:[%s1918_s20 + $0x740] sm:$0xff]  ;;  %v476_v34 = vld [vmem:[%s1918_s20 + $0x7b8] sm:$0xff] }
  0x97   : > { %1489 = vmatprep.subr.mxu1 %v410_v36  ;;  %1455 = vmatpush3.msra.mxu0 %v362_v37  ;;  %v428_v35 = vld [vmem:[%s1918_s20 + $0x638] sm:$0xff]  ;;  %v443_v37 = vld [vmem:[%s1918_s20 + $0x6b0] sm:$0xff] }
  0x98   : > { %1490 = vmatpush3.msra.mxu1 %v394_v38  ;;  %1456 = vmatprep.subr.mxu0 %v377_v39  ;;  %v460_v36 = vld [vmem:[%s1918_s20 + $0x738] sm:$0xff]  ;;  %v475_v38 = vld [vmem:[%s1918_s20 + $0x7b0] sm:$0xff] }
  0x99   : > { %1491 = vmatprep.subr.mxu1 %v409_v40  ;;  %1457 = vmatpush3.msra.mxu0 %v361_v41  ;;  %v427_v39 = vld [vmem:[%s1918_s20 + $0x630] sm:$0xff]  ;;  %v442_v41 = vld [vmem:[%s1918_s20 + $0x6a8] sm:$0xff] }
  0x9a   : > { %1492 = vmatpush3.msra.mxu1 %v393_v42  ;;  %1458 = vmatprep.subr.mxu0 %v376_v43  ;;  %v459_v40 = vld [vmem:[%s1918_s20 + $0x730] sm:$0xff]  ;;  %v474_v42 = vld [vmem:[%s1918_s20 + $0x7a8] sm:$0xff] }
  0x9b   : > { %1493 = vmatprep.subr.mxu1 %v408_v44  ;;  %1459 = vmatpush3.msra.mxu0 %v360_v25  ;;  %v426_v43 = vld [vmem:[%s1918_s20 + $0x628] sm:$0xff]  ;;  %v441_v25 = vld [vmem:[%s1918_s20 + $0x6a0] sm:$0xff] }
  0x9c   : > { %1494 = vmatpush3.msra.mxu1 %v392_v46  ;;  %1460 = vmatprep.subr.mxu0 %v375_v28  ;;  %v458_v44 = vld [vmem:[%s1918_s20 + $0x728] sm:$0xff]  ;;  %v473_v46 = vld [vmem:[%s1918_s20 + $0x7a0] sm:$0xff] }
  0x9d   : > { %1495 = vmatprep.subr.mxu1 %v407_v48  ;;  %1461 = vmatpush3.msra.mxu0 %v359_v29  ;;  %v425_v28 = vld [vmem:[%s1918_s20 + $0x620] sm:$0xff]  ;;  %v440_v29 = vld [vmem:[%s1918_s20 + $0x698] sm:$0xff] }
  0x9e   : > { %1496 = vmatpush3.msra.mxu1 %v391_v51  ;;  %1462 = vmatprep.subr.mxu0 %v374_v52  ;;  %v457_v48 = vld [vmem:[%s1918_s20 + $0x720] sm:$0xff]  ;;  %v472_v51 = vld [vmem:[%s1918_s20 + $0x798] sm:$0xff] }
  0x9f   : > { %1497 = vmatprep.subr.mxu1 %v406_v10  ;;  %1463 = vmatpush3.msra.mxu0 %v358_v2  ;;  %v424_v52 = vld [vmem:[%s1918_s20 + $0x618] sm:$0xff]  ;;  %v439_v2 = vld [vmem:[%s1918_s20 + $0x690] sm:$0xff] }
  0xa0   : > { %1498 = vmatpush3.msra.mxu1 %v390_v14  ;;  %1464 = vmatprep.subr.mxu0 %v373_v32  ;;  %v456_v10 = vld [vmem:[%s1918_s20 + $0x718] sm:$0xff]  ;;  %v471_v14 = vld [vmem:[%s1918_s20 + $0x790] sm:$0xff] }
  0xa1   : > { %1499 = vmatprep.subr.mxu1 %v405_v54  ;;  %1465 = vmatpush3.msra.mxu0 %v357_v15  ;;  %v423_v32 = vld [vmem:[%s1918_s20 + $0x610] sm:$0xff]  ;;  %v438_v15 = vld [vmem:[%s1918_s20 + $0x688] sm:$0xff] }
  0xa2   : > { %1279 = vmatprep.mubr.msk.f32.mxu0 %vm2198_vm7, %v2080_v23  ;;  %1500 = vmatpush3.msra.mxu1 %v389_v56  ;;  %v455_v54 = vld [vmem:[%s1918_s20 + $0x710] sm:$0xff]  ;;  %v470_v56 = vld [vmem:[%s1918_s20 + $0x788] sm:$0xff] }
  0xa3   : > { %1280 = vmatmul.mubr.msk.f32.vlgmr.msra.gmra.mxu0 %vm2211_vm8, %v2094_v26  ;;  %1281 = vmatprep.mubr.msk.f32.mxu1 %vm2224_vm1, %v2080_v23 }
  0xa4   : > { %1504 = vmatprep.subr.mxu0 %v452_v19  ;;  %1539 = vmatprep.subr.mxu1 %v484_v58  ;;  %v422_v19 = vld [vmem:[%s1918_s20 + $0x608] sm:$0xff] }
  0xa5   : > { %1282 = vmatmul.mubr.msk.f32.vlgmr.msra.gmra.mxu1 %vm2236_vm4, %v2094_v26  ;;  %1505 = vmatpush3.msra.mxu0 %v436_v59  ;;  %v454_v58 = vld [vmem:[%s1918_s20 + $0x708] sm:$0xff]  ;;  %v437_v59 = vld [vmem:[%s1918_s20 + $0x680] sm:$0xff] }
  0xa6   : > { %1540 = vmatpush3.msra.mxu1 %v468_v60  ;;  %1506 = vmatprep.subr.mxu0 %v451_v22  ;;  %v469_v60 = vld [vmem:[%s1918_s20 + $0x780] sm:$0xff] }
  0xa7   : > { %1541 = vmatprep.subr.mxu1 %v483_v50  ;;  %1507 = vmatpush3.msra.mxu0 %v435_v53  ;;  %v421_v22 = vld [vmem:[%s1918_s20 + $0x600] sm:$0xff] }
  0xa8   : > { %1542 = vmatpush3.msra.mxu1 %v467_v61  ;;  %1508 = vmatprep.subr.mxu0 %v450_v62  ;;  %v453_v50 = vld [vmem:[%s1918_s20 + $0x700] sm:$0xff] }
  0xa9   : > { %1543 = vmatprep.subr.mxu1 %v482_v55  ;;  %1509 = vmatpush3.msra.mxu0 %v434_v63 }
  0xaa   : > { %1544 = vmatpush3.msra.mxu1 %v466_v0  ;;  %1510 = vmatprep.subr.mxu0 %v449_v57 }
  0xab   : > { %1545 = vmatprep.subr.mxu1 %v481_v1  ;;  %1511 = vmatpush3.msra.mxu0 %v433_v4 }
  0xac   : > { %1546 = vmatpush3.msra.mxu1 %v465_v5  ;;  %1512 = vmatprep.subr.mxu0 %v448_v6 }
  0xad   : > { %1547 = vmatprep.subr.mxu1 %v480_v7  ;;  %1513 = vmatpush3.msra.mxu0 %v432_v8 }
  0xae   : > { %1548 = vmatpush3.msra.mxu1 %v464_v9  ;;  %1514 = vmatprep.subr.mxu0 %v447_v11 }
  0xaf   : > { %1549 = vmatprep.subr.mxu1 %v479_v12  ;;  %1515 = vmatpush3.msra.mxu0 %v431_v13 }
  0xb0   : > { %1550 = vmatpush3.msra.mxu1 %v463_v16  ;;  %1516 = vmatprep.subr.mxu0 %v446_v17 }
  0xb1   : > { %1551 = vmatprep.subr.mxu1 %v478_v18  ;;  %1517 = vmatpush3.msra.mxu0 %v430_v20 }
  0xb2   : > { %1552 = vmatpush3.msra.mxu1 %v462_v21  ;;  %1518 = vmatprep.subr.mxu0 %v445_v24 }
  0xb3   : > { %1553 = vmatprep.subr.mxu1 %v477_v27  ;;  %1519 = vmatpush3.msra.mxu0 %v429_v30 }
  0xb4   : > { %1554 = vmatpush3.msra.mxu1 %v461_v31  ;;  %1520 = vmatprep.subr.mxu0 %v444_v33 }
  0xb5   : > { %1555 = vmatprep.subr.mxu1 %v476_v34  ;;  %1521 = vmatpush3.msra.mxu0 %v428_v35 }
  0xb6   : > { %1556 = vmatpush3.msra.mxu1 %v460_v36  ;;  %1522 = vmatprep.subr.mxu0 %v443_v37 }
  0xb7   : > { %1557 = vmatprep.subr.mxu1 %v475_v38  ;;  %1523 = vmatpush3.msra.mxu0 %v427_v39 }
  0xb8   : > { %1558 = vmatpush3.msra.mxu1 %v459_v40  ;;  %1524 = vmatprep.subr.mxu0 %v442_v41 }
  0xb9   : > { %1559 = vmatprep.subr.mxu1 %v474_v42  ;;  %1525 = vmatpush3.msra.mxu0 %v426_v43 }
  0xba   : > { %1560 = vmatpush3.msra.mxu1 %v458_v44  ;;  %1526 = vmatprep.subr.mxu0 %v441_v25 }
  0xbb   : > { %1561 = vmatprep.subr.mxu1 %v473_v46  ;;  %1527 = vmatpush3.msra.mxu0 %v425_v28 }
  0xbc   : > { %1562 = vmatpush3.msra.mxu1 %v457_v48  ;;  %1528 = vmatprep.subr.mxu0 %v440_v29 }
  0xbd   : > { %1563 = vmatprep.subr.mxu1 %v472_v51  ;;  %1529 = vmatpush3.msra.mxu0 %v424_v52 }
  0xbe   : > { %1564 = vmatpush3.msra.mxu1 %v456_v10  ;;  %1530 = vmatprep.subr.mxu0 %v439_v2 }
  0xbf   : > { %1565 = vmatprep.subr.mxu1 %v471_v14  ;;  %1531 = vmatpush3.msra.mxu0 %v423_v32 }
  0xc0   : > { %1566 = vmatpush3.msra.mxu1 %v455_v54  ;;  %1532 = vmatprep.subr.mxu0 %v438_v15 }
  0xc1   : > { %1567 = vmatprep.subr.mxu1 %v470_v56  ;;  %1533 = vmatpush3.msra.mxu0 %v422_v19 }
  0xc2   : > { %1568 = vmatpush3.msra.mxu1 %v454_v58  ;;  %1534 = vmatprep.subr.mxu0 %v437_v59 }
  0xc3   : > { %1569 = vmatprep.subr.mxu1 %v469_v60  ;;  %1535 = vmatpush3.msra.mxu0 %v421_v22 }
  0xc4   : > { %1283 = vmatprep.mubr.msk.f32.mxu0 %vm2284_vm10, %v2080_v23  ;;  %1570 = vmatpush3.msra.mxu1 %v453_v50 }
  0xc5   : > { %1285 = vmatprep.mubr.msk.f32.mxu1 %vm2296_vm13, %v2080_v23  ;;  %1284 = vmatmul.mubr.msk.f32.vlgmr.msra.gmra.mxu0 %vm2308_vm6, %v2094_v26 }
  0xc6   : > { %1286 = vmatmul.mubr.msk.f32.vlgmr.msra.gmra.mxu1 %vm2320_vm3, %v2094_v26 }
 0x11f   : > { %v1326_v53 = vpop.f32.mrf.mxu0 }
 0x120   : > { %v1361_v61 = vpop.f32.mrf.mxu1 }
 0x121   : > { %v1327_v62 = vpop.f32.mrf.mxu0 }
 0x122   : > { %v1362_v63 = vpop.f32.mrf.mxu1  ;;  %v1328_v57 = vadd.f32 %v1327_v62, %v1326_v53 }
 0x123   : > { %v1363_v1 = vadd.f32 %v1362_v63, %v1361_v61 }
 0x125   : > { %v710_v5 = vadd.f32 %v1363_v1, %v1328_v57 }
 0x141   : > { %v1396_v55 = vpop.f32.mrf.mxu0 }
 0x143   : > { %v1431_v3 = vpop.f32.mrf.mxu1  ;;  %v1397_v0 = vpop.f32.mrf.mxu0 }
 0x144   : > { %v1398_v23 = vadd.f32 %v1397_v0, %v1396_v55 }
 0x145   : > { %v1432_v4 = vpop.f32.mrf.mxu1 }
 0x146   : > { %v780_v7 = vadd.f32 %v1398_v23, %v710_v5  ;;  %v1433_v49 = vadd.f32 %v1432_v4, %v1431_v3 }
 0x148   : > { %v850_v9 = vadd.f32 %v1433_v49, %v780_v7 }
 0x163   : > { %v1466_v45 = vpop.f32.mrf.mxu0 }
 0x165   : > { %v1501_v47 = vpop.f32.mrf.mxu1  ;;  %v1467_v6 = vpop.f32.mrf.mxu0 }
 0x166   : > { %v1468_v26 = vadd.f32 %v1467_v6, %v1466_v45 }
 0x167   : > { %v1502_v8 = vpop.f32.mrf.mxu1 }
 0x168   : > { %v920_v11 = vadd.f32 %v1468_v26, %v850_v9  ;;  %v1503_v12 = vadd.f32 %v1502_v8, %v1501_v47 }
 0x16a   : > { %v990_v20 = vadd.f32 %v1503_v12, %v920_v11 }
 0x185   : > { %v1536_v13 = vpop.f32.mrf.mxu0 }
 0x186   : > { %v1571_v16 = vpop.f32.mrf.mxu1 }
 0x187   : > { %v1537_v17 = vpop.f32.mrf.mxu0 }
 0x188   : > { %v1572_v18 = vpop.f32.mrf.mxu1  ;;  %v1538_v21 = vadd.f32 %v1537_v17, %v1536_v13 }
 0x189   : > { %v1573_v27 = vadd.f32 %v1572_v18, %v1571_v16 }
 0x18a   : > { %v1060_v24 = vadd.f32 %v1538_v21, %v990_v20 }
 0x18c   : > { %v1130_v30 = vadd.f32 %v1573_v27, %v1060_v24 }
 0x18e   : > { %1134 = vst [vmem:[%s220_s29] sm:$0xff] %v1130_v30 }
 0x18f   : > { %1713 = shalt.err (!%p1710_p7)
}
 0x190   : > { %s1714_s12 = scalar_lea.hbm %s1147_s15, 128  ;;  %s1718_s20 = scalar_lea.hbm %s2465_s2, 256 }
 0x191   : > { %p1715_p1 = scmp.ne.s32.totalorder %s1147_s15, %s1714_s12  ;;  %p1719_p3 = scmp.lt.s32.totalorder %s1147_s15, %s2465_s2 }
 0x192   : > { %p1720_p8 = scmp.lt.s32.totalorder %s1718_s20, %s1714_s12 }
 0x193   : > { %p1716_p10 = pnand %p1715_p1, %p1857_p9 }
 0x194   : > { %p1721_p0 = por %p1720_p8, %p1719_p3 }
 0x195   : > { %p1717_p13 = pneg %p1716_p10 }
 0x197   : > { %p1722_p12 = pnand %p1721_p0, %p1717_p13 }
 0x199   : > { %1725 = shalt.err (!%p1722_p12)
}
 0x19a   : > { %1578 = dma.vmem_to_hbm [thread:$0]  (%p1857_p9), %s1150_s3, 128, %s1147_s15, %s1136_s16  }
 0x19b PF: > { %s1161_s27 = sand.u32 1, %s1764_s9   ;;  %p2501_p2 = scmp.ge.s32.totalorder %s1784_s14, 2 }
 0x19c   : > { %s1162_s21 = scalar_lea.sflag [#allocation4], %s1161_s27 }
 0x19d   : > { %p1588_p5 = pnand %p2501_p2, %p1864_p11 }
 0x19f   : > { %p1589_p6 = pneg %p1588_p5 }
 0x1a1   : > { %1759 = dma.done.wait (%p1589_p6), %s1162_s21, 128  }
 0x1a2   : > { %1761 = vsyncadd (%p1589_p6), %s1162_s21, 4294967168  ;;  %s21_s14 = sadd.s32 1, %s1784_s14   ;;  %s2502_s9 = smov %s1768_s10 }
 0x1a3   : > { %p18_p4 = scmp.ge.s32.totalorder %s21_s14, 4   ;;  %s2503_s10 = smov %s1772_s11 }
 0x1a4   : > { %s2504_s11 = smov %s1862_s23  ;;  %s2505_s12 = smov %s1780_s13 }
 0x1a5   : > { %s2506_s13 = smov %s2508_s17  ;;  %20 = sbr.rel (!%p18_p4) target bundleno = 8 (0x8), region = 90 }
 0x1aa   :  { %1167 = vsyncpa [#allocation3], 1 }
 0x1ab   :  { %1169 = vsyncpa [#allocation3 + $0x1], 1 }
 0x1ac   :  { %1170 = vsyncpa [#allocation6], 1 }
 0x1ad   :  { %1172 = vsyncpa [#allocation6 + $0x1], 1 }
 0x1ae   :  { %1173 = vsyncpa [#allocation4], 1 }
 0x1af   :  { %1175 = vsyncpa [#allocation4 + $0x1], 1 }

</bundles_post_ra>
